<compile_context>
chip_gen: v5e
topology: v5e:2x2
jax: 0.10.0
libtpu: 0.0.40
codegen_flags: <defaults>
</compile_context>

<pallas_src>
import functools

import jax
import jax.numpy as jnp
from jax import lax
from jax.experimental import pallas as pl
from jax.experimental.pallas import tpu as pltpu

EPS = 1e-6  # matches PyTorch FFNLayerNorm(eps=1e-06)

# MXU-native input width. Set to jnp.float32 for ~1e-5 parity with the f32
# PyTorch reference (at a 2-4x matmul throughput cost on v5e/v6e/v7x).
MM_DTYPE = jnp.bfloat16


# ------------------------- in-kernel math helpers --------------------------

def _erf(x):
    # Abramowitz & Stegun 7.1.26 rational approximation, |err| < 1.5e-7
    # (exact at f32 precision). PyTorch nn.GELU() default is the erf form.
    p = 0.3275911
    a1, a2, a3, a4, a5 = (0.254829592, -0.284496736, 1.421413741,
                          -1.453152027, 1.061405429)
    ax = jnp.abs(x)
    t = 1.0 / (1.0 + p * ax)
    poly = ((((a5 * t + a4) * t + a3) * t + a2) * t + a1) * t
    y = 1.0 - poly * jnp.exp(-ax * ax)
    return jnp.where(x >= 0, y, -y)


def _gelu_exact(x):
    return 0.5 * x * (1.0 + _erf(x * 0.7071067811865476))


# ------------------------------ kernels -------------------------------------

def _ln_shared_kernel(x_ref, xh_ref):
    """Channel LayerNorm statistics computed ONCE, shared by q/k/v (no affine).

    Stats are per-D-column, so tiling over D columns is exact. Output is bf16
    (MM_DTYPE): it is only consumed as MXU input after a per-head affine.
    """
    x = x_ref[0].astype(jnp.float32)                      # (C, dh)
    u = jnp.mean(x, axis=0, keepdims=True)                # (1, dh)
    s = jnp.mean((x - u) ** 2, axis=0, keepdims=True)     # (1, dh)
    xh_ref[0] = ((x - u) * lax.rsqrt(s + EPS)).astype(xh_ref.dtype)


def _attn_ffn_head_kernel(x_ref, xh_ref, aff_ref, wln_ref, bln_ref,
                          w1_ref, b1_ref, w2_ref, b2_ref,
                          y_ref, w_out_ref=None):
    """One (batch, head) step: per-head LN affine -> self-attention (softmax-one)
    -> residual -> FFN LayerNorm -> Conv1d(k=1) -> GELU -> Conv1d(k=1) -> residual,
    all restricted to this head's dh-wide embedding-column slice (exact split).
    """
    xh = xh_ref[0, 0].astype(jnp.float32)                 # (C, dh) normalized x
    aff = aff_ref[0]                                      # (C, 6): wq,bq,wk,bk,wv,bv
    # q already carries the 1/sqrt(dh) attention scale (folded at param prep).
    q = (aff[:, 0:1] * xh + aff[:, 1:2]).astype(MM_DTYPE)
    k = (aff[:, 2:3] * xh + aff[:, 3:4]).astype(MM_DTYPE)
    v = (aff[:, 4:5] * xh + aff[:, 5:6]).astype(MM_DTYPE)

    # (C, dh) x (C, dh) -> (C, C) on the MXU, f32 accumulation.
    s = jnp.einsum('qd,kd->qk', q, k, preferred_element_type=jnp.float32)

    # SoftmaxOne exactly as in the PyTorch reference: x - max, exp, /(1 + sum).
    s = s - jnp.max(s, axis=-1, keepdims=True)
    e = jnp.exp(s)
    inv = 1.0 / (1.0 + jnp.sum(e, axis=-1, keepdims=True))   # exact: exported below
    w = e * inv
    if w_out_ref is not None:
        w_out_ref[0, 0] = w.astype(w_out_ref.dtype)

    o = jnp.dot(w.astype(MM_DTYPE), v, preferred_element_type=jnp.float32)  # (C, dh)

    # attn.transpose(1, 2).reshape(b, c, d): head h occupies embedding columns
    # [h*dh, (h+1)*dh) -> exactly this grid step's output block (lane-dense).
    x1 = x_ref[0].astype(jnp.float32) + o                 # residual 1

    # FFN on this column slice: channel LayerNorm stats are per column -> exact.
    u = jnp.mean(x1, axis=0, keepdims=True)
    var = jnp.mean((x1 - u) ** 2, axis=0, keepdims=True)
    z = wln_ref[...] * ((x1 - u) * lax.rsqrt(var + EPS)) + bln_ref[...]

    # Conv1d(k=1) matmuls: D is a free axis, so the dh-column split is exact.
    h1 = jnp.dot(w1_ref[...], z.astype(MM_DTYPE),
                 preferred_element_type=jnp.float32) + b1_ref[...]
    h1 = _gelu_exact(h1)
    f = jnp.dot(w2_ref[...], h1.astype(MM_DTYPE),
                preferred_element_type=jnp.float32) + b2_ref[...]

    y_ref[0] = (x1 + f).astype(y_ref.dtype)               # residual 2 (out_dim=None)


# ------------------------------ wrappers -------------------------------------

def trans_block_forward(x, params, *, num_heads, return_attn_weights=True):
    """TransBlock.forward(x1) with x2 = x3 = None (so x = x1)."""
    b, c, d = x.shape
    assert d % num_heads == 0, "embedding_dim must be divisible by num_heads"
    dh = d // num_heads
    H = num_heads
    hid = params["w1"].shape[0]
    # Per-head column blocks must be lane-aligned (or be the whole D axis).
    assert dh % 128 == 0 or dh == d, (
        f"dh={dh} must be a multiple of 128 (or num_heads == 1) for lane-dense "
        "per-head blocks")

    # ---- kernel 1: shared LayerNorm statistics (computed once for q/k/v) ----
    # Output stored in MM_DTYPE (bf16): halves the inter-kernel HBM round trip.
    xh = pl.pallas_call(
        _ln_shared_kernel,
        grid=(b, H),
        in_specs=[pl.BlockSpec((1, c, dh), lambda i, j: (i, 0, j))],
        out_specs=pl.BlockSpec((1, c, dh), lambda i, j: (i, 0, j)),
        out_shape=jax.ShapeDtypeStruct((b, c, d), MM_DTYPE),
        compiler_params=pltpu.CompilerParams(
            dimension_semantics=("parallel", "parallel")),
    )(x)

    # Contiguous row-major reshape == the torch q.reshape(b, H, c, d//H)
    # (pure relabelling / bitcast in XLA, no data movement).
    xh4 = xh.reshape(b, H, c, dh)

    # Per-channel LN affines laid out per the torch reshape (element [h, c', :]
    # uses channel (h*c + c') // H); 1/sqrt(dh) attention scale folded into q.
    # All six packed into ONE (H, c, 6) array so only one lane-padded block
    # sits in VMEM instead of six.
    scale = 1.0 / (dh ** 0.5)

    def head_layout(p):                                   # (c,1) -> (H, c)
        return jnp.broadcast_to(p, (c, d)).reshape(H, c, dh)[:, :, 0]

    aff = jnp.stack(
        [head_layout(params["wq"]) * scale, head_layout(params["bq"]) * scale,
         head_layout(params["wk"]), head_layout(params["bk"]),
         head_layout(params["wv"]), head_layout(params["bv"])],
        axis=-1).astype(jnp.float32)                      # (H, c, 6)

    # Pre-cast the matmul weights to MM_DTYPE once (halves DMA bytes + VMEM).
    w1 = params["w1"].astype(MM_DTYPE)
    w2 = params["w2"].astype(MM_DTYPE)

    def full(shape):
        return pl.BlockSpec(shape, lambda i, j, _s=shape: (0,) * len(_s))

    in_specs = [
        pl.BlockSpec((1, c, dh), lambda i, j: (i, 0, j)),        # x (residual)
        pl.BlockSpec((1, 1, c, dh), lambda i, j: (i, j, 0, 0)),  # normalized x, head j
        pl.BlockSpec((1, c, 6), lambda i, j: (j, 0, 0)),         # packed q/k/v affines
        full((c, 1)), full((c, 1)),                               # FFN LN weight/bias
        full((hid, c)), full((hid, 1)),                           # Conv1d #1 (bf16 W)
        full((c, hid)), full((c, 1)),                             # Conv1d #2 (bf16 W)
    ]
    out_specs = [pl.BlockSpec((1, c, dh), lambda i, j: (i, 0, j))]
    out_shape = [jax.ShapeDtypeStruct((b, c, d), x.dtype)]
    if return_attn_weights:
        out_specs.append(pl.BlockSpec((1, 1, c, c), lambda i, j: (i, j, 0, 0)))
        out_shape.append(jax.ShapeDtypeStruct((b, H, c, c), jnp.float32))

    # ---- kernel 2: per-(batch, head) fused attention + residual + FFN ----
    outs = pl.pallas_call(
        _attn_ffn_head_kernel,
        grid=(b, H),
        in_specs=in_specs,
        out_specs=out_specs,
        out_shape=out_shape,
        compiler_params=pltpu.CompilerParams(
            dimension_semantics=("parallel", "parallel")),
    )(x, xh4, aff, params["w_ln"], params["b_ln"],
      w1, params["b1"], w2, params["b2"])

    if return_attn_weights:
        return outs[0], outs[1]
    return outs[0], None


# ------------------------------ params ---------------------------------------

def init_params(key, in_channel, expansion_ratio=4):
    c = in_channel
    hid = c * expansion_ratio
    k1, k2, k3, k4 = jax.random.split(key, 4)
    f32 = jnp.float32
    ones_c = jnp.ones((c, 1), f32)
    zeros_c = jnp.zeros((c, 1), f32)
    return {
        # FFNLayerNorm params (PyTorch init: ones / zeros)
        "wq": ones_c, "bq": zeros_c,
        "wk": ones_c, "bk": zeros_c,
        "wv": ones_c, "bv": zeros_c,
        "w_ln": ones_c, "b_ln": zeros_c,
        # Conv1d(k=1) params: weight (C_out, C_in), bias (C_out, 1)
        "w1": 0.1 * jax.random.normal(k1, (hid, c), f32),
        "b1": 0.1 * jax.random.normal(k2, (hid, 1), f32),
        "w2": 0.1 * jax.random.normal(k3, (c, hid), f32),
        "b2": 0.1 * jax.random.normal(k4, (c, 1), f32),
    }


# ------------------------------ pure-JAX reference ---------------------------

def _reference_forward(x, params, *, num_heads):
    b, c, d = x.shape
    dh = d // num_heads

    def ln(xx, w, bias):
        u = xx.mean(axis=1, keepdims=True)
        s = ((xx - u) ** 2).mean(axis=1, keepdims=True)
        return w[None] * ((xx - u) / jnp.sqrt(s + EPS)) + bias[None]

    q = ln(x, params["wq"], params["bq"]).reshape(b, num_heads, c, dh)
    k = ln(x, params["wk"], params["bk"]).reshape(b, num_heads, c, dh)
    v = ln(x, params["wv"], params["bv"]).reshape(b, num_heads, c, dh)
    s = (q / (dh ** 0.5)) @ jnp.swapaxes(k, -2, -1)
    s = s - s.max(axis=-1, keepdims=True)
    e = jnp.exp(s)
    w = e / (1.0 + e.sum(axis=-1, keepdims=True))
    x_attn = jnp.swapaxes(w @ v, 1, 2).reshape(b, c, d)
    x1 = x + x_attn
    z = ln(x1, params["w_ln"], params["b_ln"])
    h1 = jnp.einsum('oc,bcd->bod', params["w1"], z) + params["b1"][None]
    h1 = jax.nn.gelu(h1, approximate=False)
    f = jnp.einsum('co,bod->bcd', params["w2"], h1) + params["b2"][None]
    return x1 + f, w


# ------------------------------- main ----------------------------------------

if __name__ == "__main__":
    # Small demo shapes: C sublane-friendly, dh = D/H = 128 (lane-aligned
    # per-head column blocks).
    B, C, D, H = 2, 8, 512, 4          # batch, in_channel, embedding_dim, heads
    key = jax.random.PRNGKey(0)
    kx, kp = jax.random.split(key)
    x = jax.random.normal(kx, (B, C, D), dtype=jnp.float32)
    params = init_params(kp, C)

    fwd = jax.jit(functools.partial(trans_block_forward, num_heads=H))
    y, attn_w = fwd(x, params)
    jax.block_until_ready((y, attn_w))

    assert y.shape == (B, C, D), y.shape
    assert attn_w.shape == (B, H, C, C), attn_w.shape
    assert bool(jnp.all(jnp.isfinite(y))) and bool(jnp.all(jnp.isfinite(attn_w)))

    # Loose tolerance: kernel uses bf16 MXU inputs and a bf16 inter-kernel
    # intermediate (f32 accumulation / elementwise math); reference is plain
    # f32 JAX. Set MM_DTYPE = jnp.float32 above for ~1e-5 parity.
    y_ref, w_ref = _reference_forward(x, params, num_heads=H)
    assert float(jnp.max(jnp.abs(attn_w - w_ref))) < 1e-1
    assert float(jnp.max(jnp.abs(y - y_ref))) < 3e-1

    print("KERNEL_OK")
</pallas_src>

<mosaic_0001>
module attributes {stable_mosaic.version = 11 : i64} {
  func.func @_ln_shared_kernel(%arg0: i32, %arg1: i32, %arg2: memref<1x8x128xf32, #tpu.memory_space<vmem>>, %arg3: memref<1x8x128xbf16, #tpu.memory_space<vmem>>) attributes {dimension_semantics = [#tpu.dimension_semantics<parallel>, #tpu.dimension_semantics<parallel>], iteration_bounds = array<i64: 2, 4>, scalar_prefetch = 0 : i64, scratch_operands = 0 : i64, tpu.core_type = #tpu.core_type<tc>, window_params = [{transform_indices = @transform_0, window_bounds = array<i64: 1, 8, 128>}, {transform_indices = @transform_1, window_bounds = array<i64: 1, 8, 128>}]} {
    %c0 = arith.constant 0 : index
    %c0_0 = arith.constant 0 : index
    %c0_1 = arith.constant 0 : index
    %0 = vector.load %arg2[%c0, %c0_0, %c0_1] : memref<1x8x128xf32, #tpu.memory_space<vmem>>, vector<1x8x128xf32>
    %1 = vector.shape_cast %0 : vector<1x8x128xf32> to vector<8x128xf32>
    %cst = arith.constant dense<0.000000e+00> : vector<128xf32>
    %2 = vector.multi_reduction <add>, %1, %cst [0] : vector<8x128xf32> to vector<128xf32>
    %3 = vector.shape_cast %2 : vector<128xf32> to vector<1x128xf32>
    %cst_2 = arith.constant 8.000000e+00 : f32
    %4 = vector.broadcast %cst_2 : f32 to vector<1x128xf32>
    %5 = arith.divf %3, %4 : vector<1x128xf32>
    %6 = vector.broadcast %5 : vector<1x128xf32> to vector<8x128xf32>
    %7 = arith.subf %1, %6 : vector<8x128xf32>
    %8 = arith.mulf %7, %7 : vector<8x128xf32>
    %cst_3 = arith.constant dense<0.000000e+00> : vector<128xf32>
    %9 = vector.multi_reduction <add>, %8, %cst_3 [0] : vector<8x128xf32> to vector<128xf32>
    %10 = vector.shape_cast %9 : vector<128xf32> to vector<1x128xf32>
    %cst_4 = arith.constant 8.000000e+00 : f32
    %11 = vector.broadcast %cst_4 : f32 to vector<1x128xf32>
    %12 = arith.divf %10, %11 : vector<1x128xf32>
    %13 = vector.broadcast %5 : vector<1x128xf32> to vector<8x128xf32>
    %14 = arith.subf %1, %13 : vector<8x128xf32>
    %cst_5 = arith.constant 9.99999997E-7 : f32
    %15 = vector.broadcast %cst_5 : f32 to vector<1x128xf32>
    %16 = arith.addf %12, %15 : vector<1x128xf32>
    %17 = math.rsqrt %16 : vector<1x128xf32>
    %18 = vector.broadcast %17 : vector<1x128xf32> to vector<8x128xf32>
    %19 = arith.mulf %14, %18 : vector<8x128xf32>
    %20 = arith.truncf %19 : vector<8x128xf32> to vector<8x128xbf16>
    %c0_6 = arith.constant 0 : index
    %c0_7 = arith.constant 0 : index
    %c0_8 = arith.constant 0 : index
    %21 = vector.load %arg3[%c0_6, %c0_7, %c0_8] : memref<1x8x128xbf16, #tpu.memory_space<vmem>>, vector<1x8x128xbf16>
    %22 = vector.shape_cast %21 : vector<1x8x128xbf16> to vector<8x128xbf16>
    %23 = vector.shape_cast %20 : vector<8x128xbf16> to vector<1x8x128xbf16>
    tpu.vector_store %arg3[%c0_6, %c0_7, %c0_8], %23 {strides = array<i32>} : memref<1x8x128xbf16, #tpu.memory_space<vmem>>, vector<1x8x128xbf16>,
    return
  }
  func.func @transform_0(%arg0: i32, %arg1: i32) -> (i32, i32, i32) {
    %c0_i32 = arith.constant 0 : i32
    %c0_i32_0 = arith.constant 0 : i32
    return %arg0, %c0_i32, %arg1 : i32, i32, i32
  }
  func.func @transform_1(%arg0: i32, %arg1: i32) -> (i32, i32, i32) {
    %c0_i32 = arith.constant 0 : i32
    %c0_i32_0 = arith.constant 0 : i32
    return %arg0, %c0_i32, %arg1 : i32, i32, i32
  }
}

module attributes {stable_mosaic.version = 11 : i64} {
  func.func @_attn_ffn_head_kernel(%arg0: i32, %arg1: i32, %arg2: memref<1x8x128xf32, #tpu.memory_space<vmem>>, %arg3: memref<1x1x8x128xbf16, #tpu.memory_space<vmem>>, %arg4: memref<1x8x6xf32, #tpu.memory_space<vmem>>, %arg5: memref<8x1xf32, #tpu.memory_space<vmem>>, %arg6: memref<8x1xf32, #tpu.memory_space<vmem>>, %arg7: memref<32x8xbf16, #tpu.memory_space<vmem>>, %arg8: memref<32x1xf32, #tpu.memory_space<vmem>>, %arg9: memref<8x32xbf16, #tpu.memory_space<vmem>>, %arg10: memref<8x1xf32, #tpu.memory_space<vmem>>, %arg11: memref<1x8x128xf32, #tpu.memory_space<vmem>>, %arg12: memref<1x1x8x8xf32, #tpu.memory_space<vmem>>) attributes {dimension_semantics = [#tpu.dimension_semantics<parallel>, #tpu.dimension_semantics<parallel>], iteration_bounds = array<i64: 2, 4>, scalar_prefetch = 0 : i64, scratch_operands = 0 : i64, tpu.core_type = #tpu.core_type<tc>, window_params = [{transform_indices = @transform_0, window_bounds = array<i64: 1, 8, 128>}, {transform_indices = @transform_1, window_bounds = array<i64: 1, 1, 8, 128>}, {transform_indices = @transform_2, window_bounds = array<i64: 1, 8, 6>}, {pipeline_mode = #tpu.pipeline_mode<synchronous>, transform_indices = @transform_3, window_bounds = array<i64: 8, 1>}, {pipeline_mode = #tpu.pipeline_mode<synchronous>, transform_indices = @transform_4, window_bounds = array<i64: 8, 1>}, {pipeline_mode = #tpu.pipeline_mode<synchronous>, transform_indices = @transform_5, window_bounds = array<i64: 32, 8>}, {pipeline_mode = #tpu.pipeline_mode<synchronous>, transform_indices = @transform_6, window_bounds = array<i64: 32, 1>}, {pipeline_mode = #tpu.pipeline_mode<synchronous>, transform_indices = @transform_7, window_bounds = array<i64: 8, 32>}, {pipeline_mode = #tpu.pipeline_mode<synchronous>, transform_indices = @transform_8, window_bounds = array<i64: 8, 1>}, {transform_indices = @transform_9, window_bounds = array<i64: 1, 8, 128>}, {transform_indices = @transform_10, window_bounds = array<i64: 1, 1, 8, 8>}]} {
    %c0 = arith.constant 0 : index
    %c0_0 = arith.constant 0 : index
    %c0_1 = arith.constant 0 : index
    %c0_2 = arith.constant 0 : index
    %0 = vector.load %arg3[%c0, %c0_0, %c0_1, %c0_2] : memref<1x1x8x128xbf16, #tpu.memory_space<vmem>>, vector<1x1x8x128xbf16>
    %1 = vector.shape_cast %0 : vector<1x1x8x128xbf16> to vector<8x128xbf16>
    %2 = arith.extf %1 : vector<8x128xbf16> to vector<8x128xf32>
    %c0_3 = arith.constant 0 : index
    %c0_4 = arith.constant 0 : index
    %c0_5 = arith.constant 0 : index
    %3 = vector.load %arg4[%c0_3, %c0_4, %c0_5] : memref<1x8x6xf32, #tpu.memory_space<vmem>>, vector<1x8x6xf32>
    %4 = vector.shape_cast %3 : vector<1x8x6xf32> to vector<8x6xf32>
    %5 = vector.extract_strided_slice %4 {offsets = [0, 0], sizes = [8, 1], strides = [1, 1]} : vector<8x6xf32> to vector<8x1xf32>
    %6 = vector.broadcast %5 : vector<8x1xf32> to vector<8x128xf32>
    %7 = arith.mulf %6, %2 : vector<8x128xf32>
    %8 = vector.extract_strided_slice %4 {offsets = [0, 1], sizes = [8, 1], strides = [1, 1]} : vector<8x6xf32> to vector<8x1xf32>
    %9 = vector.broadcast %8 : vector<8x1xf32> to vector<8x128xf32>
    %10 = arith.addf %7, %9 : vector<8x128xf32>
    %11 = arith.truncf %10 : vector<8x128xf32> to vector<8x128xbf16>
    %12 = vector.extract_strided_slice %4 {offsets = [0, 2], sizes = [8, 1], strides = [1, 1]} : vector<8x6xf32> to vector<8x1xf32>
    %13 = vector.broadcast %12 : vector<8x1xf32> to vector<8x128xf32>
    %14 = arith.mulf %13, %2 : vector<8x128xf32>
    %15 = vector.extract_strided_slice %4 {offsets = [0, 3], sizes = [8, 1], strides = [1, 1]} : vector<8x6xf32> to vector<8x1xf32>
    %16 = vector.broadcast %15 : vector<8x1xf32> to vector<8x128xf32>
    %17 = arith.addf %14, %16 : vector<8x128xf32>
    %18 = arith.truncf %17 : vector<8x128xf32> to vector<8x128xbf16>
    %19 = vector.extract_strided_slice %4 {offsets = [0, 4], sizes = [8, 1], strides = [1, 1]} : vector<8x6xf32> to vector<8x1xf32>
    %20 = vector.broadcast %19 : vector<8x1xf32> to vector<8x128xf32>
    %21 = arith.mulf %20, %2 : vector<8x128xf32>
    %22 = vector.extract_strided_slice %4 {offsets = [0, 5], sizes = [8, 1], strides = [1, 1]} : vector<8x6xf32> to vector<8x1xf32>
    %23 = vector.broadcast %22 : vector<8x1xf32> to vector<8x128xf32>
    %24 = arith.addf %21, %23 : vector<8x128xf32>
    %25 = arith.truncf %24 : vector<8x128xf32> to vector<8x128xbf16>
    "tpu.trace_start"() <{level = 10 : i32, message = "qd,kd->qk"}> : () -> ()
    %cst = arith.constant dense<0.000000e+00> : vector<8x8xf32>
    %26 = tpu.matmul %11, %18, %cst {dimension_numbers = #tpu.dot_dimension_numbers<[1], [1], [0], [0], [0, 0, 1, 0], [], []>} : vector<8x128xbf16>, vector<8x128xbf16>, vector<8x8xf32> -> vector<8x8xf32>
    "tpu.trace_stop"() : () -> ()
    %cst_6 = arith.constant dense<0xFF800000> : vector<8xf32>
    %27 = vector.multi_reduction <maximumf>, %26, %cst_6 [1] : vector<8x8xf32> to vector<8xf32>
    %28 = vector.shape_cast %27 : vector<8xf32> to vector<8x1xf32>
    %29 = vector.broadcast %28 : vector<8x1xf32> to vector<8x8xf32>
    %30 = arith.subf %26, %29 : vector<8x8xf32>
    %31 = math.exp %30 : vector<8x8xf32>
    %cst_7 = arith.constant dense<0.000000e+00> : vector<8xf32>
    %32 = vector.multi_reduction <add>, %31, %cst_7 [1] : vector<8x8xf32> to vector<8xf32>
    %33 = vector.shape_cast %32 : vector<8xf32> to vector<8x1xf32>
    %cst_8 = arith.constant 1.000000e+00 : f32
    %34 = vector.broadcast %cst_8 : f32 to vector<8x1xf32>
    %35 = arith.addf %34, %33 : vector<8x1xf32>
    %cst_9 = arith.constant 1.000000e+00 : f32
    %36 = vector.broadcast %cst_9 : f32 to vector<8x1xf32>
    %37 = arith.divf %36, %35 : vector<8x1xf32>
    %38 = vector.broadcast %37 : vector<8x1xf32> to vector<8x8xf32>
    %39 = arith.mulf %31, %38 : vector<8x8xf32>
    %c0_10 = arith.constant 0 : index
    %c0_11 = arith.constant 0 : index
    %c0_12 = arith.constant 0 : index
    %c0_13 = arith.constant 0 : index
    %40 = vector.load %arg12[%c0_10, %c0_11, %c0_12, %c0_13] : memref<1x1x8x8xf32, #tpu.memory_space<vmem>>, vector<1x1x8x8xf32>
    %41 = vector.shape_cast %40 : vector<1x1x8x8xf32> to vector<8x8xf32>
    %42 = vector.shape_cast %39 : vector<8x8xf32> to vector<1x1x8x8xf32>
    tpu.vector_store %arg12[%c0_10, %c0_11, %c0_12, %c0_13], %42 {strides = array<i32>} : memref<1x1x8x8xf32, #tpu.memory_space<vmem>>, vector<1x1x8x8xf32>,
    %43 = arith.truncf %39 : vector<8x8xf32> to vector<8x8xbf16>
    %cst_14 = arith.constant dense<0.000000e+00> : vector<8x128xf32>
    %44 = tpu.matmul %43, %25, %cst_14 {dimension_numbers = #tpu.dot_dimension_numbers<[1], [0], [0], [1], [0, 0, 1, 1], [], []>} : vector<8x8xbf16>, vector<8x128xbf16>, vector<8x128xf32> -> vector<8x128xf32>
    %c0_15 = arith.constant 0 : index
    %c0_16 = arith.constant 0 : index
    %c0_17 = arith.constant 0 : index
    %45 = vector.load %arg2[%c0_15, %c0_16, %c0_17] : memref<1x8x128xf32, #tpu.memory_space<vmem>>, vector<1x8x128xf32>
    %46 = vector.shape_cast %45 : vector<1x8x128xf32> to vector<8x128xf32>
    %47 = arith.addf %46, %44 : vector<8x128xf32>
    %cst_18 = arith.constant dense<0.000000e+00> : vector<128xf32>
    %48 = vector.multi_reduction <add>, %47, %cst_18 [0] : vector<8x128xf32> to vector<128xf32>
    %49 = vector.shape_cast %48 : vector<128xf32> to vector<1x128xf32>
    %cst_19 = arith.constant 8.000000e+00 : f32
    %50 = vector.broadcast %cst_19 : f32 to vector<1x128xf32>
    %51 = arith.divf %49, %50 : vector<1x128xf32>
    %52 = vector.broadcast %51 : vector<1x128xf32> to vector<8x128xf32>
    %53 = arith.subf %47, %52 : vector<8x128xf32>
    %54 = arith.mulf %53, %53 : vector<8x128xf32>
    %cst_20 = arith.constant dense<0.000000e+00> : vector<128xf32>
    %55 = vector.multi_reduction <add>, %54, %cst_20 [0] : vector<8x128xf32> to vector<128xf32>
    %56 = vector.shape_cast %55 : vector<128xf32> to vector<1x128xf32>
    %cst_21 = arith.constant 8.000000e+00 : f32
    %57 = vector.broadcast %cst_21 : f32 to vector<1x128xf32>
    %58 = arith.divf %56, %57 : vector<1x128xf32>
    %c0_22 = arith.constant 0 : index
    %c0_23 = arith.constant 0 : index
    %59 = vector.load %arg5[%c0_22, %c0_23] : memref<8x1xf32, #tpu.memory_space<vmem>>, vector<8x1xf32>
    %60 = vector.broadcast %51 : vector<1x128xf32> to vector<8x128xf32>
    %61 = arith.subf %47, %60 : vector<8x128xf32>
    %cst_24 = arith.constant 9.99999997E-7 : f32
    %62 = vector.broadcast %cst_24 : f32 to vector<1x128xf32>
    %63 = arith.addf %58, %62 : vector<1x128xf32>
    %64 = math.rsqrt %63 : vector<1x128xf32>
    %65 = vector.broadcast %64 : vector<1x128xf32> to vector<8x128xf32>
    %66 = arith.mulf %61, %65 : vector<8x128xf32>
    %67 = vector.broadcast %59 : vector<8x1xf32> to vector<8x128xf32>
    %68 = arith.mulf %67, %66 : vector<8x128xf32>
    %c0_25 = arith.constant 0 : index
    %c0_26 = arith.constant 0 : index
    %69 = vector.load %arg6[%c0_25, %c0_26] : memref<8x1xf32, #tpu.memory_space<vmem>>, vector<8x1xf32>
    %70 = vector.broadcast %69 : vector<8x1xf32> to vector<8x128xf32>
    %71 = arith.addf %68, %70 : vector<8x128xf32>
    %c0_27 = arith.constant 0 : index
    %c0_28 = arith.constant 0 : index
    %72 = vector.load %arg7[%c0_27, %c0_28] : memref<32x8xbf16, #tpu.memory_space<vmem>>, vector<32x8xbf16>
    %73 = arith.truncf %71 : vector<8x128xf32> to vector<8x128xbf16>
    %cst_29 = arith.constant dense<0.000000e+00> : vector<32x128xf32>
    %74 = tpu.matmul %72, %73, %cst_29 {dimension_numbers = #tpu.dot_dimension_numbers<[1], [0], [0], [1], [0, 0, 1, 1], [], []>} : vector<32x8xbf16>, vector<8x128xbf16>, vector<32x128xf32> -> vector<32x128xf32>
    %c0_30 = arith.constant 0 : index
    %c0_31 = arith.constant 0 : index
    %75 = vector.load %arg8[%c0_30, %c0_31] : memref<32x1xf32, #tpu.memory_space<vmem>>, vector<32x1xf32>
    %76 = vector.broadcast %75 : vector<32x1xf32> to vector<32x128xf32>
    %77 = arith.addf %74, %76 : vector<32x128xf32>
    %cst_32 = arith.constant 5.000000e-01 : f32
    %78 = vector.broadcast %cst_32 : f32 to vector<32x128xf32>
    %79 = arith.mulf %78, %77 : vector<32x128xf32>
    %cst_33 = arith.constant 0.707106769 : f32
    %80 = vector.broadcast %cst_33 : f32 to vector<32x128xf32>
    %81 = arith.mulf %77, %80 : vector<32x128xf32>
    %82 = math.absf %81 : vector<32x128xf32>
    %cst_34 = arith.constant 0.327591091 : f32
    %83 = vector.broadcast %cst_34 : f32 to vector<32x128xf32>
    %84 = arith.mulf %83, %82 : vector<32x128xf32>
    %cst_35 = arith.constant 1.000000e+00 : f32
    %85 = vector.broadcast %cst_35 : f32 to vector<32x128xf32>
    %86 = arith.addf %85, %84 : vector<32x128xf32>
    %cst_36 = arith.constant 1.000000e+00 : f32
    %87 = vector.broadcast %cst_36 : f32 to vector<32x128xf32>
    %88 = arith.divf %87, %86 : vector<32x128xf32>
    %cst_37 = arith.constant 1.06140542 : f32
    %89 = vector.broadcast %cst_37 : f32 to vector<32x128xf32>
    %90 = arith.mulf %89, %88 : vector<32x128xf32>
    %cst_38 = arith.constant -1.45315206 : f32
    %91 = vector.broadcast %cst_38 : f32 to vector<32x128xf32>
    %92 = arith.addf %90, %91 : vector<32x128xf32>
    %93 = arith.mulf %92, %88 : vector<32x128xf32>
    %cst_39 = arith.constant 1.42141378 : f32
    %94 = vector.broadcast %cst_39 : f32 to vector<32x128xf32>
    %95 = arith.addf %93, %94 : vector<32x128xf32>
    %96 = arith.mulf %95, %88 : vector<32x128xf32>
    %cst_40 = arith.constant -0.284496725 : f32
    %97 = vector.broadcast %cst_40 : f32 to vector<32x128xf32>
    %98 = arith.addf %96, %97 : vector<32x128xf32>
    %99 = arith.mulf %98, %88 : vector<32x128xf32>
    %cst_41 = arith.constant 0.254829586 : f32
    %100 = vector.broadcast %cst_41 : f32 to vector<32x128xf32>
    %101 = arith.addf %99, %100 : vector<32x128xf32>
    %102 = arith.mulf %101, %88 : vector<32x128xf32>
    %cst_42 = arith.constant 0.000000e+00 : f32
    %103 = vector.broadcast %cst_42 : f32 to vector<32x128xf32>
    %104 = arith.subf %103, %82 : vector<32x128xf32>
    %105 = arith.mulf %104, %82 : vector<32x128xf32>
    %106 = math.exp %105 : vector<32x128xf32>
    %107 = arith.mulf %102, %106 : vector<32x128xf32>
    %cst_43 = arith.constant 1.000000e+00 : f32
    %108 = vector.broadcast %cst_43 : f32 to vector<32x128xf32>
    %109 = arith.subf %108, %107 : vector<32x128xf32>
    %cst_44 = arith.constant 0.000000e+00 : f32
    %110 = vector.broadcast %cst_44 : f32 to vector<32x128xf32>
    %111 = arith.cmpf oge, %81, %110 : vector<32x128xf32>
    %cst_45 = arith.constant 0.000000e+00 : f32
    %112 = vector.broadcast %cst_45 : f32 to vector<32x128xf32>
    %113 = arith.subf %112, %109 : vector<32x128xf32>
    %114 = arith.select %111, %109, %113 : vector<32x128xi1>, vector<32x128xf32>
    %cst_46 = arith.constant 1.000000e+00 : f32
    %115 = vector.broadcast %cst_46 : f32 to vector<32x128xf32>
    %116 = arith.addf %115, %114 : vector<32x128xf32>
    %117 = arith.mulf %79, %116 : vector<32x128xf32>
    %c0_47 = arith.constant 0 : index
    %c0_48 = arith.constant 0 : index
    %118 = vector.load %arg9[%c0_47, %c0_48] : memref<8x32xbf16, #tpu.memory_space<vmem>>, vector<8x32xbf16>
    %119 = arith.truncf %117 : vector<32x128xf32> to vector<32x128xbf16>
    %cst_49 = arith.constant dense<0.000000e+00> : vector<8x128xf32>
    %120 = tpu.matmul %118, %119, %cst_49 {dimension_numbers = #tpu.dot_dimension_numbers<[1], [0], [0], [1], [0, 0, 1, 1], [], []>} : vector<8x32xbf16>, vector<32x128xbf16>, vector<8x128xf32> -> vector<8x128xf32>
    %c0_50 = arith.constant 0 : index
    %c0_51 = arith.constant 0 : index
    %121 = vector.load %arg10[%c0_50, %c0_51] : memref<8x1xf32, #tpu.memory_space<vmem>>, vector<8x1xf32>
    %122 = vector.broadcast %121 : vector<8x1xf32> to vector<8x128xf32>
    %123 = arith.addf %120, %122 : vector<8x128xf32>
    %124 = arith.addf %47, %123 : vector<8x128xf32>
    %c0_52 = arith.constant 0 : index
    %c0_53 = arith.constant 0 : index
    %c0_54 = arith.constant 0 : index
    %125 = vector.load %arg11[%c0_52, %c0_53, %c0_54] : memref<1x8x128xf32, #tpu.memory_space<vmem>>, vector<1x8x128xf32>
    %126 = vector.shape_cast %125 : vector<1x8x128xf32> to vector<8x128xf32>
    %127 = vector.shape_cast %124 : vector<8x128xf32> to vector<1x8x128xf32>
    tpu.vector_store %arg11[%c0_52, %c0_53, %c0_54], %127 {strides = array<i32>} : memref<1x8x128xf32, #tpu.memory_space<vmem>>, vector<1x8x128xf32>,
    return
  }
  func.func @transform_0(%arg0: i32, %arg1: i32) -> (i32, i32, i32) {
    %c0_i32 = arith.constant 0 : i32
    %c0_i32_0 = arith.constant 0 : i32
    return %arg0, %c0_i32, %arg1 : i32, i32, i32
  }
  func.func @transform_1(%arg0: i32, %arg1: i32) -> (i32, i32, i32, i32) {
    %c0_i32 = arith.constant 0 : i32
    %c0_i32_0 = arith.constant 0 : i32
    %c0_i32_1 = arith.constant 0 : i32
    return %arg0, %arg1, %c0_i32, %c0_i32_0 : i32, i32, i32, i32
  }
  func.func @transform_2(%arg0: i32, %arg1: i32) -> (i32, i32, i32) {
    %c0_i32 = arith.constant 0 : i32
    %c0_i32_0 = arith.constant 0 : i32
    %c0_i32_1 = arith.constant 0 : i32
    return %arg1, %c0_i32, %c0_i32_0 : i32, i32, i32
  }
  func.func @transform_3(%arg0: i32, %arg1: i32) -> (i32, i32) {
    %c0_i32 = arith.constant 0 : i32
    %c0_i32_0 = arith.constant 0 : i32
    %c0_i32_1 = arith.constant 0 : i32
    return %c0_i32, %c0_i32_0 : i32, i32
  }
  func.func @transform_4(%arg0: i32, %arg1: i32) -> (i32, i32) {
    %c0_i32 = arith.constant 0 : i32
    %c0_i32_0 = arith.constant 0 : i32
    %c0_i32_1 = arith.constant 0 : i32
    return %c0_i32, %c0_i32_0 : i32, i32
  }
  func.func @transform_5(%arg0: i32, %arg1: i32) -> (i32, i32) {
    %c0_i32 = arith.constant 0 : i32
    %c0_i32_0 = arith.constant 0 : i32
    %c0_i32_1 = arith.constant 0 : i32
    return %c0_i32, %c0_i32_0 : i32, i32
  }
  func.func @transform_6(%arg0: i32, %arg1: i32) -> (i32, i32) {
    %c0_i32 = arith.constant 0 : i32
    %c0_i32_0 = arith.constant 0 : i32
    %c0_i32_1 = arith.constant 0 : i32
    return %c0_i32, %c0_i32_0 : i32, i32
  }
  func.func @transform_7(%arg0: i32, %arg1: i32) -> (i32, i32) {
    %c0_i32 = arith.constant 0 : i32
    %c0_i32_0 = arith.constant 0 : i32
    %c0_i32_1 = arith.constant 0 : i32
    return %c0_i32, %c0_i32_0 : i32, i32
  }
  func.func @transform_8(%arg0: i32, %arg1: i32) -> (i32, i32) {
    %c0_i32 = arith.constant 0 : i32
    %c0_i32_0 = arith.constant 0 : i32
    %c0_i32_1 = arith.constant 0 : i32
    return %c0_i32, %c0_i32_0 : i32, i32
  }
  func.func @transform_9(%arg0: i32, %arg1: i32) -> (i32, i32, i32) {
    %c0_i32 = arith.constant 0 : i32
    %c0_i32_0 = arith.constant 0 : i32
    return %arg0, %c0_i32, %arg1 : i32, i32, i32
  }
  func.func @transform_10(%arg0: i32, %arg1: i32) -> (i32, i32, i32, i32) {
    %c0_i32 = arith.constant 0 : i32
    %c0_i32_0 = arith.constant 0 : i32
    %c0_i32_1 = arith.constant 0 : i32
    return %arg0, %arg1, %c0_i32, %c0_i32_0 : i32, i32, i32, i32
  }
}

</mosaic_0001>

<bundles_post_ra>
// kernel: trans_block_forward.2
= control target key start
LH: loop header
LB: loop body
LE: loop exit
PB: predicated region body
PF: predicated region fallthrough
CT: control target
= control target key end

     0   :  { %s379_s6 = smov 0   ;;  %s381_s7 = smov 0   ;;  %s434_s0 = inlined_call_operand.vmem [shape: f32[2,8,512], index: 0, kind: input, shape index: {}]   ;;  %s435_s1 = inlined_call_operand.vmem [shape: bf16[2,8,512], index: 1, kind: output, shape index: {}]  }
   0x1   :  { %s383_s8 = smov 0   ;;  %s385_s9 = smov 0  }
   0x2   :  { %s387_s10 = smov 0  }
   0x3 LB: > { %s20_s11 = sadd.s32 1, %s358_s8  ;;  %s23_s12 = sadd.s32 1, %s362_s9  ;;  %s366_s10 = sphi %s387_s10, %s11_s10   ;;  %s362_s9 = sphi %s385_s9, %s439_s9   ;;  %s358_s8 = sphi %s383_s8, %s438_s8   ;;  %s354_s7 = sphi %s381_s7, %s437_s7   ;;  %s350_s6 = sphi %s379_s6, %s436_s6  }
   0x4   : > { %p21_p0 = scmp.ge.s32.totalorder %s20_s11, 4  ;;  %p276_p1 = scmp.ge.s32.totalorder %s366_s10, 1 }
   0x5   : > { %p106_p2 = scmp.lt.s32.totalorder %s366_s10, 9 }
   0x6   : > { %s441_s11 = smov (%p21_p0, %s20_s11), 0  ;;  %s443_s12 = smov (!%p21_p0, %s23_s12), %s362_s9 }
   0x7   : > { %p107_p3 = pnand %p276_p1, %p106_p2  ;;  %p25_p4 = scmp.ge.s32.totalorder %s443_s12, 2 }
   0x8   : > { %p132_p5 = scmp.lt.s32.totalorder (!%p107_p3), %s354_s7, 1  ;;  %p134_p6 = scmp.lt.s32.totalorder (!%p107_p3), %s350_s6, 3 }
   0x9   : > { %s445_s12 = smov (%p25_p4, %s443_s12), 0  ;;  %110 = sbr.rel (%p107_p3) target bundleno = 77 (0x4d), region = 24 }
   0xe   : > { %v368_v0 = vmov 8.0   ;;  %s447_s7 = smov (!%p132_p5, %s354_s7), 1  ;;  %s449_s6 = smov (!%p134_p6, %s350_s6), 3 }
   0xf   : > { %324 = vrcp.f32 %v368_v0  ;;  %s277_s13 = sshll.u32 %s447_s7, 2 }
  0x10   : > { %s409_s14 = sadd.s32 %s277_s13, %s449_s6 }
  0x11   : > { %s278_s15 = sshll.u32 %s409_s14, 3  ;;  %s280_s19 = sshll.u32 %s409_s14, 2 }
  0x12   : > { %s139_s18 = scalar_lea.vmem %s434_s0, %s278_s15  ;;  %s147_s22 = scalar_lea.vmem %s435_s1, %s280_s19 }
  0x13   : > { %v148_v2 = vld [vmem:[%s139_s18] sm:$0xff] }
  0x14   : > { %v149_v4 = vrot.slane %v148_v2, 4 }
  0x15   : > { %v325_v1 = vpop.eup %324 }
  0x16   : > { %v156_v3 = vmul.f32 8.0, %v325_v1  ;;  %v150_v6 = vadd.f32 %v149_v4, %v148_v2  ;;  %vm160_vm0 = vweird.f32 %v325_v1 }
  0x18   : > { %v157_v5 = vsub.f32 1.0, %v156_v3  ;;  %v151_v8 = vrot.slane %v150_v6, 2 }
  0x1a   : > { %v158_v7 = vmul.f32 %v325_v1, %v157_v5  ;;  %v152_v10 = vadd.f32 %v151_v8, %v150_v6 }
  0x1c   : > { %v159_v9 = vadd.f32 %v325_v1, %v158_v7  ;;  %v153_v11 = vrot.slane %v152_v10, 1 }
  0x1e   : > { %v161_v12 = vsel %vm160_vm0, %v325_v1, %v159_v9  ;;  %v154_v13 = vadd.f32 %v153_v11, %v152_v10 }
  0x20   : > { %v162_v14 = vmul.f32 %v161_v12, %v154_v13 }
  0x22   : > { %v163_v15 = vsub.f32 %v148_v2, %v162_v14 }
  0x24   : > { %v164_v16 = vmul.f32 %v163_v15, %v163_v15 }
  0x26   : > { %v165_v17 = vrot.slane %v164_v16, 4 }
  0x28   : > { %v166_v18 = vadd.f32 %v165_v17, %v164_v16 }
  0x2a   : > { %v167_v19 = vrot.slane %v166_v18, 2 }
  0x2c   : > { %v168_v20 = vadd.f32 %v167_v19, %v166_v18 }
  0x2e   : > { %v169_v21 = vrot.slane %v168_v20, 1 }
  0x30   : > { %v170_v22 = vadd.f32 %v169_v21, %v168_v20 }
  0x32   : > { %v171_v23 = vmul.f32 %v170_v22, %v161_v12 }
  0x34   : > { %v172_v24 = vadd.f32 1e-06, %v171_v23 }
  0x36   : > { %326 = vrsqrt.f32 %v172_v24  ;;  %vm179_vm1 = vweird.f32 %v172_v24 }
  0x3c   : > { %v327_v25 = vpop.eup %326 }
  0x3d   : > { %v174_v26 = vmul.f32 %v327_v25, %v172_v24  ;;  %vm180_vm2 = vweird.f32 %v327_v25 }
  0x3e   : > { %vm181_vm3 = vmor %vm179_vm1, %vm180_vm2 }
  0x3f   : > { %v175_v27 = vmul.f32 %v327_v25, %v174_v26 }
  0x41   : > { %v176_v28 = vmul.f32 0.5, %v175_v27 }
  0x43   : > { %v177_v29 = vsub.f32 1.5, %v176_v28 }
  0x45   : > { %v178_v30 = vmul.f32 %v327_v25, %v177_v29 }
  0x47   : > { %v182_v31 = vsel %vm181_vm3, %v327_v25, %v178_v30 }
  0x48   : > { %v183_v32 = vmul.f32 %v182_v31, %v163_v15 }
  0x4a   : > { %v184_v33 = vpack.c.bf16 %v183_v32, %v183_v32 }
  0x4c   : > { %185 = vst [vmem:[%s147_s22] sm:$0xf] %v184_v33 }
  0x4d PF: > { %s11_s10 = sadd.s32 1, %s366_s10   ;;  %s436_s6 = smov %s358_s8 }
  0x4e   : > { %p8_p7 = scmp.ge.s32.totalorder %s11_s10, 10   ;;  %s437_s7 = smov %s362_s9 }
  0x4f   : > { %s438_s8 = smov %s441_s11  ;;  %s439_s9 = smov %s445_s12 }
  0x50   :  { %10 = sbr.rel (!%p8_p7) target bundleno = 3 (0x3), region = 54 }

// kernel: trans_block_forward.3
= control target key start
LH: loop header
LB: loop body
LE: loop exit
PB: predicated region body
PF: predicated region fallthrough
CT: control target
= control target key end

     0   :  { %s1640_s0 = inlined_call_operand.vmem [shape: f32[2,8,512], index: 0, kind: input, shape index: {}]   ;;  %s1641_s1 = inlined_call_operand.vmem [shape: bf16[2,4,8,128], index: 1, kind: input, shape index: {}]   ;;  %s1642_s2 = inlined_call_operand.vmem [shape: f32[4,8,6], index: 2, kind: input, shape index: {}]   ;;  %s1643_s3 = inlined_call_operand.vmem [shape: f32[8,1], index: 3, kind: input, shape index: {}]   ;;  %s1644_s4 = inlined_call_operand.vmem [shape: f32[8,1], index: 4, kind: input, shape index: {}]   ;;  %s1645_s5 = inlined_call_operand.vmem [shape: bf16[32,8], index: 5, kind: input, shape index: {}]   ;;  %s1646_s6 = inlined_call_operand.vmem [shape: f32[32,1], index: 6, kind: input, shape index: {}]   ;;  %s1647_s7 = inlined_call_operand.vmem [shape: bf16[8,32], index: 7, kind: input, shape index: {}]   ;;  %s1648_s8 = inlined_call_operand.vmem [shape: f32[8,1], index: 8, kind: input, shape index: {}]   ;;  %s1649_s9 = inlined_call_operand.hbm [shape: f32[2,8,512], index: 9, kind: output, shape index: {0}]   ;;  %s1650_s10 = inlined_call_operand.hbm [shape: f32[2,4,8,8], index: 10, kind: output, shape index: {1}]  }
   0x1   :  { %1655 = sst [smem:[#allocation11_spill]] %s1640_s0 }
   0x2   :  { %1656 = sst [smem:[#allocation12_spill]] %s1641_s1 }
   0x3   :  { %1657 = sst [smem:[#allocation13_spill]] %s1642_s2 }
   0x4   :  { %1658 = sst [smem:[#allocation14_spill]] %s1643_s3 }
   0x5   :  { %1659 = sst [smem:[#allocation15_spill]] %s1644_s4 }
   0x6   :  { %16 = vsyncpa [#allocation3], 0 }
   0x7   :  { %18 = vsyncpa [#allocation3 + $0x1], 0 }
   0x8   :  { %19 = vsyncpa [#allocation5], 0 }
   0x9   :  { %21 = vsyncpa [#allocation5 + $0x1], 0  ;;  %s1372_s13 = smov 0   ;;  %s1374_s14 = smov 0  }
   0xa   :  { %s1376_s15 = smov 0   ;;  %s1378_s16 = smov 0  }
   0xb   :  { %s1380_s17 = smov 0   ;;  %s1382_s18 = smov 0  }
   0xc   :  { %s1384_s19 = smov 0   ;;  %s1386_s20 = smov 0  }
   0xd LB: > { %1660 = sst [smem:[#allocation8_spill]] %s1304_s19  ;;  %s1032_s21 = sadd.s32 4294967295, %s1308_s20   ;;  %s1308_s20 = sphi %s1386_s20, %s27_s20   ;;  %s1304_s19 = sphi %s1384_s19, %s1673_s19   ;;  %s1300_s18 = sphi %s1382_s18, %s1678_s18   ;;  %s1296_s17 = sphi %s1380_s17, %s1671_s17   ;;  %s1292_s16 = sphi %s1378_s16, %s1677_s16   ;;  %s1288_s15 = sphi %s1376_s15, %s1676_s15   ;;  %s1284_s14 = sphi %s1374_s14, %s1675_s14   ;;  %s1280_s13 = sphi %s1372_s13, %s1674_s13  }
   0xe   : > { %s1033_s22 = sadd.s32 4294967294, %s1308_s20   ;;  %s36_s23 = sadd.s32 1, %s1300_s18 }
   0xf   : > { %p37_p0 = scmp.ge.s32.totalorder %s36_s23, 4  ;;  %s39_s24 = sadd.s32 1, %s1304_s19 }
  0x10   : > { %p266_p1 = scmp.ne.s32.totalorder %s1288_s15, %s1284_s14  ;;  %p267_p2 = scmp.eq.s32.totalorder %s1032_s21, 7 }
  0x11   : > { %s1680_s23 = smov (%p37_p0, %s36_s23), 0  ;;  %s1682_s24 = smov (!%p37_p0, %s39_s24), %s1304_s19 }
  0x12   : > { %1661 = sst [smem:[#allocation9_spill]] %s1680_s23  ;;  %s252_s25 = ssub.s32 %s1300_s18, %s1680_s23 }
  0x13   : > { %p1423_p3 = por %p267_p2, %p266_p1  ;;  %p41_p4 = scmp.ge.s32.totalorder %s1682_s24, 2 }
  0x14   : > { %p272_p5 = scmp.ne.s32.totalorder %s1284_s14, %s1280_s13  ;;  %p273_p6 = scmp.eq.s32.totalorder %s1033_s22, 7 }
  0x15   : > { %p1036_p7 = scmp.ge.s32.totalorder %s1308_s20, 1  ;;  %s1684_s24 = smov (%p41_p4, %s1682_s24), 0 }
  0x16   : > { %1663 = sst [smem:[#allocation10_spill]] %s1684_s24  ;;  %p1432_p8 = por %p273_p6, %p272_p5 }
  0x17   : > { %p366_p9 = scmp.lt.s32.totalorder %s1308_s20, 9  ;;  %s251_s28 = ssub.s32 %s1304_s19, %s1684_s24 }
  0x18   : > { %s256_s29 = sadd.s32 1, %s1288_s15  ;;  %s253_s30 = sor.u32 %s252_s25, %s251_s28 }
  0x19   : > { %p367_p10 = pnand %p1036_p7, %p366_p9  ;;  %p254_p11 = scmp.eq.s32.totalorder %s253_s30, 0 }
  0x1a   : > { %p426_p12 = scmp.lt.s32.totalorder (!%p367_p10), %s1292_s16, 3  ;;  %s1665_s2 = sld [smem:[#allocation13_spill]] (!%p367_p10) }
  0x1b   : > { %s1441_s11 = scalar_select %p254_p11, %s1288_s15, %s256_s29  }
  0x1c   : > { %370 = sbr.rel (%p367_p10) target bundleno = 1120 (0x460), region = 56  ;;  %p424_p13 = scmp.lt.s32.totalorder (!%p367_p10), %s1296_s17, 1 }
  0x1d   : > { %s1666_s1 = sld [smem:[#allocation12_spill]] (!%p367_p10)  ;;  %s1478_s22 = sand.u32 (!%p367_p10), 1, %s1284_s14  }
  0x1e   : > { %s1667_s3 = sld [smem:[#allocation14_spill]] (!%p367_p10) }
  0x1f   : > { %s1668_s4 = sld [smem:[#allocation15_spill]] (!%p367_p10) }
  0x20   : > { %s1669_s0 = sld [smem:[#allocation11_spill]] (!%p367_p10) }
  0x21   : > { %v1310_v0 = vmov 2   ;;  %v1311_v1 = vmov 0   ;;  %s427_s12 = scalar_select %p426_p12, %s1292_s16, 3  ;;  %v1312_v3 = vmov 1   ;;  %v1313_v4 = vmov 3   ;;  %v603_v29 = vld [vmem:[%s1646_s6 + $0x18] sm:$0xff] }
  0x22   : > { %1149 = vset.pattern.permute.xlu0 %v1310_v0  ;;  %1151 = vset.pattern.permute.xlu1 %v1311_v1  ;;  %s425_s28 = scalar_select %p424_p13, %s1296_s17, 1  ;;  %vm495_vm0 = vcmask 64512   ;;  %v1314_v20 = vmov 4   ;;  %v1315_v21 = vmov 5   ;;  %v602_v30 = vld [vmem:[%s1646_s6 + $0x10] sm:$0xff]  ;;  %v825_v35 = vld [vmem:[%s1648_s8] sm:$0xff] }
  0x23   : > { %s1043_s21 = sshll.u32 %s427_s12, 3  ;;  %1154 = vset.pattern.permute.xlu2 %v1315_v21  ;;  %v600_v36 = vld [vmem:[%s1646_s6] sm:$0xff]  ;;  %vm527_vm1 = vcmask 1043456   ;;  %v1316_v53 = vmov 8.0  }
  0x24   : > { %s443_s25 = scalar_lea.vmem %s1665_s2, %s1043_s21  ;;  %s1039_s29 = sshll.u32 %s425_s28, 2  ;;  %v569_v27 = vld [vmem:[%s1667_s3] sm:$0xff] }
  0x25   : > { %v447_v2 = vld [vmem:[%s443_s25] sm:$0xff]  ;;  %s1450_s30 = sadd.s32 %s1039_s29, %s427_s12  ;;  %s1654_s25 = sshll.u32 %s1478_s22, 3 }
  0x26   : > { %450 = vperm.xlu1 %1151, %v447_v2   ;;  %461 = vperm.xlu0 %1149, %v447_v2   ;;  %s1042_s23 = sshll.u32 %s1450_s30, 2  ;;  %v588_v28 = vld [vmem:[%s1668_s4] sm:$0xff]  ;;  %s1483_s28 = scalar_lea.vmem [#allocation4], %s1654_s25 }
  0x27   : > { %s439_s21 = scalar_lea.vmem %s1666_s1, %s1042_s23  ;;  %s1040_s29 = sshll.u32 %s1450_s30, 3 }
  0x28   : > { %v445_v6 = vld [vmem:[%s439_s21] sm:$0xf]  ;;  %s431_s19 = scalar_lea.vmem %s1669_s0, %s1040_s29  ;;  %s1058_s23 = sshll.u32 %s1296_s17, 2 }
  0x29   : > { %v446_v8 = vunpack.c.l.bf16 %v445_v6  ;;  %v544_v56 = vld [vmem:[%s431_s19] sm:$0xff]  ;;  %s866_s12 = sadd.s32 %s1292_s16, %s1058_s23  ;;  %s886_s0 = sshll.u32 %s1483_s28, 4  ;;  %s887_s0 = int_to_ptr.vmem [resolvable:$true] %s886_s0 }
  0x2a   : > { %s1059_s29 = sshll.u32 %s866_s12, 3  ;;  %s856_s2 = scalar_lea.sflag [#allocation5], %s1478_s22 }
  0x2b   : > { %s884_s25 = scalar_lea.hbm %s1650_s10, %s1059_s29  ;;  %s1202_s16 = scalar_lea.hbm %s1650_s10, 64 }
  0x2c   : > { %s888_s1 = sshll.u32 %s884_s25, 4  ;;  %s889_s1 = int_to_ptr.hbm [resolvable:$true] %s888_s1 }
  0x2d   : > { %s1196_s3 = sshra.s32 %s889_s1, 4  ;;  %s1197_s3 = int_to_ptr.hbm [resolvable:$true] %s1196_s3 }
  0x2e   : > { %1152 = vset.pattern.permute.xlu1 %v1312_v3  ;;  %1150 = vset.pattern.permute.xlu0 %v1313_v4  ;;  %s1198_s4 = scalar_lea.hbm %s1197_s3, 8  ;;  %p1203_p4 = scmp.lt.s32.totalorder %s1197_s3, %s1650_s10 }
  0x2f   : > { %455 = vperm.xlu1 %1152, %v447_v2   ;;  %466 = vperm.xlu0 %1150, %v447_v2   ;;  %p1199_p0 = scmp.ne.s32.totalorder %s1197_s3, %s1198_s4  ;;  %p1204_p5 = scmp.lt.s32.totalorder %s1202_s16, %s1198_s4 }
  0x31   : > { %p1200_p1 = pnand %p1199_p0, %p1423_p3  ;;  %p1205_p6 = por %p1204_p5, %p1203_p4 }
  0x33   : > { %p1201_p2 = pneg %p1200_p1 }
  0x35   : > { %p1206_p7 = pnand %p1205_p6, %p1201_p2 }
  0x37   : > { %1155 = vset.pattern.permute.xlu0 %v1311_v1  ;;  %1153 = vset.pattern.permute.xlu1 %v1314_v20 }
  0x38   : > { %472 = vperm.xlu1 %1153, %v447_v2   ;;  %584 = vperm.xlu0 %1155, %v569_v27  }
  0x40   : > { %1156 = vset.pattern.permute.xlu1 %v1311_v1  ;;  %621 = vperm.xlu0 %1155, %v603_v29  }
  0x41   : > { %591 = vperm.xlu1 %1156, %v588_v28  }
  0x48   : > { %828 = vperm.xlu0 %1155, %v825_v35  }
  0x49   : > { %616 = vperm.xlu1 %1156, %v602_v30  }
  0x51   : > { %606 = vperm.xlu1 %1156, %v600_v36  }
  0x98   : > { %v462_v5 = vpop.permute.xlu0 %461  ;;  %v451_v7 = vpop.permute.xlu1 %450 }
  0x99   : > { %v464_v9 = vmul.f32 %v462_v5, %v446_v8  ;;  %v453_v12 = vmul.f32 %v451_v7, %v446_v8 }
  0xa1   : > { %v467_v10 = vpop.permute.xlu0 %466  ;;  %v456_v13 = vpop.permute.xlu1 %455 }
  0xa2   : > { %v469_v11 = vadd.f32 %v467_v10, %v464_v9  ;;  %v458_v15 = vadd.f32 %v456_v13, %v453_v12 }
  0xa4   : > { %v470_v14 = vpack.c.bf16 %v469_v11, %v469_v11  ;;  %v459_v16 = vpack.c.bf16 %v458_v15, %v458_v15 }
  0xa6   : > { %489 = vmatpush.bf16.xpose.msra.mxu0 %v470_v14 }
  0xaa   : > { %v473_v33 = vpop.permute.xlu1 %472 }
  0xab   : > { %v475_v34 = vmul.f32 %v473_v33, %v446_v8  ;;  %v1065_v33 = vld [vmem:[%s1645_s5 + $0x8] sm:$0xff] }
  0xad   : > { %490 = vmatmul.bf16.vlgmr.msra.gmra.mxu0 %v459_v16 }
  0xb3   : > { %v592_v28 = vpop.permute.xlu1 %591 }
 0x12a   : > { %v491_v17 = vpop.f32.mrf.mxu0 }
 0x12b   : > { %v496_v18 = vsel %vm495_vm0, %v491_v17, -inf }
 0x12c   : > { %497 = vmax.xlane.f32.xlu2 %v496_v18 }
 0x132   : > { %v493_v19 = vpop.f32.mrf.mxu0 }
 0x19f   : > { %v498_v22 = vpop.xlane.xlu2 %497 }
 0x1a0   : > { %v499_v23 = vsub.f32 %v491_v17, %v498_v22  ;;  %v601_v22 = vld [vmem:[%s1646_s6 + $0x8] sm:$0xff] }
 0x1a2   : > { %v500_v24 = vmul.f32 1.442695, %v499_v23 }
 0x1a4   : > { %1158 = vpow2.f32 %v500_v24 }
 0x1aa   : > { %v1159_v25 = vpop.eup %1158 }
 0x1ab   : > { %v502_v26 = vsel %vm495_vm0, %v1159_v25, 0.0 }
 0x1ac   : > { %503 = vadd.xlane.f32.xlu2 %v502_v26  ;;  %v585_v26 = vpop.permute.xlu0 %584 }
 0x1c4   : > { %477 = vperm.xlu2 %1154, %v447_v2  }
 0x1cc   : > { %1157 = vset.pattern.permute.xlu2 %v1311_v1 }
 0x1cd   : > { %611 = vperm.xlu2 %1157, %v601_v22  }
 0x21f   : > { %v504_v31 = vpop.xlane.xlu2 %503 }
 0x220   : > { %v505_v32 = vadd.f32 1.0, %v504_v31 }
 0x222   : > { %1160 = vrcp.f32 %v505_v32  ;;  %v517_v44 = vand.u32 2147483648, %v505_v32  ;;  %v515_v46 = vand.u32 2147483647, %v505_v32  ;;  %vm511_vm3 = vweird.f32 %v505_v32 }
 0x223   : > { %1162 = vrcp.f32 %v1316_v53 }
 0x224   : > { %v518_v48 = vor.u32 1.1754944e-38, %v517_v44  ;;  %vm516_vm5 = vcmp.eq.f32.partialorder %v515_v46, 8.507059e+37 }
 0x227   : > { %v478_v37 = vpop.permute.xlu2 %477 }
 0x228   : > { %v1161_v38 = vpop.eup %1160  ;;  %v480_v39 = vadd.f32 %v478_v37, %v475_v34  ;;  %v617_v34 = vpop.permute.xlu1 %616 }
 0x229   : > { %v507_v40 = vmul.f32 %v1161_v38, %v505_v32  ;;  %vm512_vm2 = vweird.f32 %v1161_v38  ;;  %v1163_v54 = vpop.eup %1162  ;;  %v1064_v32 = vld [vmem:[%s1645_s5] sm:$0xff] }
 0x22a   : > { %v481_v41 = vpack.c.bf16 %v480_v39, %v480_v39  ;;  %vm513_vm4 = vmor %vm511_vm3, %vm512_vm2  ;;  %v553_v55 = vmul.f32 8.0, %v1163_v54  ;;  %vm557_vm6 = vweird.f32 %v1163_v54 }
 0x22b   : > { %v508_v42 = vsub.f32 1.0, %v507_v40 }
 0x22c   : > { %v529_v43 = vsel %vm527_vm1, %v481_v41, 0  ;;  %v554_v58 = vsub.f32 1.0, %v553_v55 }
 0x22d   : > { %v509_v45 = vmul.f32 %v1161_v38, %v508_v42  ;;  %538 = vmatpush.bf16.msra.mxu1 %v529_v43 }
 0x22e   : > { %v555_v61 = vmul.f32 %v1163_v54, %v554_v58 }
 0x22f   : > { %v510_v47 = vadd.f32 %v1161_v38, %v509_v45  ;;  %v612_v40 = vpop.permute.xlu2 %611 }
 0x230   : > { %v556_v1 = vadd.f32 %v1163_v54, %v555_v61  ;;  %v607_v35 = vpop.permute.xlu1 %606 }
 0x231   : > { %v514_v49 = vsel %vm513_vm4, %v1161_v38, %v510_v47 }
 0x232   : > { %v519_v50 = vsel %vm516_vm5, %v518_v48, %v514_v49  ;;  %v558_v4 = vsel %vm557_vm6, %v1163_v54, %v556_v1 }
 0x233   : > { %v521_v51 = vmul.f32 %v1159_v25, %v519_v50 }
 0x235   : > { %v523_v52 = vpack.c.bf16 %v521_v51, %v521_v51  ;;  %522 = vst.msk [vmem:[%s1483_s28] sm:$0xff] %vm495_vm0, %v521_v51 }
 0x237   : > { %1044 = vmatmul.msk.bf16.vlgmr.msra.gmra.mxu1 %vm495_vm0, %v523_v52 }
 0x2b4   : > { %v540_v57 = vpop.f32.mrf.mxu1 }
 0x2b5   : > { %v1492_v59 = vadd.f32 %v544_v56, %v540_v57 }
 0x2b7   : > { %v546_v60 = vrot.slane %v1492_v59, 4 }
 0x2b9   : > { %v547_v62 = vadd.f32 %v546_v60, %v1492_v59  ;;  %v622_v60 = vpop.permute.xlu0 %621 }
 0x2bb   : > { %v548_v63 = vrot.slane %v547_v62, 2 }
 0x2bc   : > { %v542_v0 = vpop.f32.mrf.mxu1 }
 0x2bd   : > { %v549_v2 = vadd.f32 %v548_v63, %v547_v62 }
 0x2bf   : > { %v550_v3 = vrot.slane %v549_v2, 1 }
 0x2c1   : > { %v551_v5 = vadd.f32 %v550_v3, %v549_v2 }
 0x2c3   : > { %v559_v6 = vmul.f32 %v558_v4, %v551_v5 }
 0x2c5   : > { %v560_v7 = vsub.f32 %v1492_v59, %v559_v6 }
 0x2c7   : > { %v561_v8 = vmul.f32 %v560_v7, %v560_v7 }
 0x2c9   : > { %v562_v9 = vrot.slane %v561_v8, 4 }
 0x2cb   : > { %v563_v10 = vadd.f32 %v562_v9, %v561_v8 }
 0x2cd   : > { %v564_v11 = vrot.slane %v563_v10, 2 }
 0x2cf   : > { %v565_v12 = vadd.f32 %v564_v11, %v563_v10 }
 0x2d1   : > { %v566_v13 = vrot.slane %v565_v12, 1 }
 0x2d3   : > { %v567_v14 = vadd.f32 %v566_v13, %v565_v12 }
 0x2d5   : > { %v568_v15 = vmul.f32 %v567_v14, %v558_v4 }
 0x2d7   : > { %v570_v16 = vadd.f32 1e-06, %v568_v15 }
 0x2d9   : > { %1164 = vrsqrt.f32 %v570_v16  ;;  %vm577_vm8 = vweird.f32 %v570_v16 }
 0x2df   : > { %v1165_v17 = vpop.eup %1164 }
 0x2e0   : > { %v572_v18 = vmul.f32 %v1165_v17, %v570_v16  ;;  %vm578_vm7 = vweird.f32 %v1165_v17 }
 0x2e1   : > { %vm579_vm9 = vmor %vm577_vm8, %vm578_vm7 }
 0x2e2   : > { %v573_v19 = vmul.f32 %v1165_v17, %v572_v18 }
 0x2e4   : > { %v574_v20 = vmul.f32 0.5, %v573_v19 }
 0x2e6   : > { %v575_v21 = vsub.f32 1.5, %v574_v20 }
 0x2e8   : > { %v576_v23 = vmul.f32 %v1165_v17, %v575_v21 }
 0x2ea   : > { %v580_v24 = vsel %vm579_vm9, %v1165_v17, %v576_v23 }
 0x2eb   : > { %v581_v25 = vmul.f32 %v580_v24, %v560_v7 }
 0x2ed   : > { %v587_v27 = vmul.f32 %v585_v26, %v581_v25 }
 0x2ef   : > { %v594_v29 = vadd.f32 %v592_v28, %v587_v27 }
 0x2f1   : > { %v599_v30 = vpack.c.bf16 %v594_v29, %v594_v29 }
 0x2f3   : > { %v641_v31 = vsel %vm527_vm1, %v599_v30, 0 }
 0x2f4   : > { %650 = vmatpush.bf16.msra.mxu2 %v641_v31 }
 0x2f7   : > { %1053 = vmatmul.msk.bf16.vlgmr.msra.gmra.mxu2 %vm495_vm0, %v1064_v32 }
 0x307   : > { %1054 = vmatmul.msk.bf16.gmra.mxu2 %vm495_vm0, %v1065_v33 }
 0x37a   : > { %v652_v36 = vpop.f32.mrf.mxu2 }
 0x37b   : > { %v1509_v37 = vadd.f32 %v652_v36, %v607_v35 }
 0x37d   : > { %v1512_v38 = vmul.f32 0.70710677, %v1509_v37 }
 0x37f   : > { %v1515_v39 = vand.u32 2147483647, %v1512_v38 }
 0x381   : > { %v674_v41 = vmul.f32 0.3275911, %v1515_v39 }
 0x382   : > { %v654_v42 = vpop.f32.mrf.mxu2 }
 0x383   : > { %v678_v43 = vadd.f32 1.0, %v674_v41  ;;  %v1518_v44 = vadd.f32 %v654_v42, %v612_v40 }
 0x385   : > { %1166 = vrcp.f32 %v678_v43  ;;  %v1521_v45 = vmul.f32 0.70710677, %v1518_v44  ;;  %v693_v57 = vand.u32 2147483648, %v678_v43  ;;  %vm687_vm11 = vweird.f32 %v678_v43 }
 0x386   : > { %v691_v63 = vand.u32 2147483647, %v678_v43 }
 0x387   : > { %v1524_v46 = vand.u32 2147483647, %v1521_v45  ;;  %v694_v4 = vor.u32 1.1754944e-38, %v693_v57 }
 0x388   : > { %vm692_vm13 = vcmp.eq.f32.partialorder %v691_v63, 8.507059e+37 }
 0x389   : > { %v675_v47 = vmul.f32 0.3275911, %v1524_v46  ;;  %v779_v42 = vsub.f32 0.0, %v1524_v46 }
 0x38a   : > { %v657_v48 = vpop.f32.mrf.mxu2 }
 0x38b   : > { %v1167_v49 = vpop.eup %1166  ;;  %v1527_v50 = vadd.f32 %v657_v48, %v617_v34  ;;  %v679_v52 = vadd.f32 1.0, %v675_v47 }
 0x38c   : > { %v683_v51 = vmul.f32 %v1167_v49, %v678_v43  ;;  %vm688_vm10 = vweird.f32 %v1167_v49 }
 0x38d   : > { %v1530_v53 = vmul.f32 0.70710677, %v1527_v50  ;;  %1168 = vrcp.f32 %v679_v52  ;;  %vm689_vm12 = vmor %vm687_vm11, %vm688_vm10  ;;  %v708_v11 = vand.u32 2147483648, %v679_v52  ;;  %v706_v14 = vand.u32 2147483647, %v679_v52 }
 0x38e   : > { %v684_v54 = vsub.f32 1.0, %v683_v51  ;;  %vm702_vm15 = vweird.f32 %v679_v52  ;;  %v778_v51 = vsub.f32 0.0, %v1515_v39  ;;  %vm803_vm11 = vcmp.ge.f32.partialorder %v1521_v45, 0.0 }
 0x38f   : > { %v1533_v55 = vand.u32 2147483647, %v1530_v53  ;;  %v709_v20 = vor.u32 1.1754944e-38, %v708_v11  ;;  %vm707_vm1 = vcmp.eq.f32.partialorder %v706_v14, 8.507059e+37  ;;  %vm804_vm10 = vcmp.ge.f32.partialorder %v1530_v53, 0.0 }
 0x390   : > { %v685_v56 = vmul.f32 %v1167_v49, %v684_v54 }
 0x391   : > { %v676_v58 = vmul.f32 0.3275911, %v1533_v55  ;;  %v780_v36 = vsub.f32 0.0, %v1533_v55 }
 0x392   : > { %v659_v61 = vpop.f32.mrf.mxu2  ;;  %v686_v62 = vadd.f32 %v1167_v49, %v685_v56 }
 0x393   : > { %v680_v0 = vadd.f32 1.0, %v676_v58  ;;  %v1536_v1 = vadd.f32 %v659_v61, %v622_v60  ;;  %v1169_v2 = vpop.eup %1168  ;;  %v784_v57 = vmul.f32 %v780_v36, %v1533_v55  ;;  %v783_v61 = vmul.f32 %v779_v42, %v1524_v46 }
 0x394   : > { %v690_v3 = vsel %vm689_vm12, %v1167_v49, %v686_v62  ;;  %v698_v5 = vmul.f32 %v1169_v2, %v679_v52  ;;  %vm703_vm14 = vweird.f32 %v1169_v2  ;;  %vm802_vm12 = vcmp.ge.f32.partialorder %v1512_v38, 0.0 }
 0x395   : > { %1170 = vrcp.f32 %v680_v0  ;;  %v1539_v6 = vmul.f32 0.70710677, %v1536_v1  ;;  %v1541_v8 = vsel %vm692_vm13, %v694_v4, %v690_v3  ;;  %vm704_vm0 = vmor %vm702_vm15, %vm703_vm14  ;;  %v723_v23 = vand.u32 2147483648, %v680_v0 }
 0x396   : > { %v699_v7 = vsub.f32 1.0, %v698_v5  ;;  %v742_v12 = vmul.f32 1.0614054, %v1541_v8  ;;  %v721_v27 = vand.u32 2147483647, %v680_v0  ;;  %vm717_vm3 = vweird.f32 %v680_v0 }
 0x397   : > { %v1544_v9 = vand.u32 2147483647, %v1539_v6  ;;  %v724_v31 = vor.u32 1.1754944e-38, %v723_v23  ;;  %v782_v3 = vmul.f32 %v778_v51, %v1515_v39  ;;  %v788_v11 = vmul.f32 1.442695, %v783_v61 }
 0x398   : > { %v700_v10 = vmul.f32 %v1169_v2, %v699_v7  ;;  %v746_v17 = vadd.f32 -1.4531521, %v742_v12  ;;  %vm722_vm5 = vcmp.eq.f32.partialorder %v721_v27, 8.507059e+37  ;;  %v790_v7 = vmul.f32 1.442695, %v784_v57 }
 0x399   : > { %v677_v13 = vmul.f32 0.3275911, %v1544_v9  ;;  %v781_v12 = vsub.f32 0.0, %v1544_v9  ;;  %vm805_vm13 = vcmp.ge.f32.partialorder %v1539_v6, 0.0  ;;  %v662_v38 = vmul.f32 0.5, %v1509_v37 }
 0x39a   : > { %v701_v16 = vadd.f32 %v1169_v2, %v700_v10  ;;  %v750_v25 = vmul.f32 %v746_v17, %v1541_v8  ;;  %vm831_vm14 = vcmask 261120  }
 0x39b   : > { %v1171_v15 = vpop.eup %1170  ;;  %v681_v19 = vadd.f32 1.0, %v677_v13 }
 0x39c   : > { %v713_v18 = vmul.f32 %v1171_v15, %v680_v0  ;;  %v705_v21 = vsel %vm704_vm0, %v1169_v2, %v701_v16  ;;  %vm718_vm2 = vweird.f32 %v1171_v15  ;;  %v754_v32 = vadd.f32 1.4214138, %v750_v25 }
 0x39d   : > { %1172 = vrcp.f32 %v681_v19  ;;  %v1548_v24 = vsel %vm707_vm1, %v709_v20, %v705_v21  ;;  %vm719_vm4 = vmor %vm717_vm3, %vm718_vm2  ;;  %v738_v52 = vand.u32 2147483648, %v681_v19  ;;  %v736_v60 = vand.u32 2147483647, %v681_v19 }
 0x39e   : > { %v714_v22 = vsub.f32 1.0, %v713_v18  ;;  %v743_v28 = vmul.f32 1.0614054, %v1548_v24  ;;  %v758_v49 = vmul.f32 %v754_v32, %v1541_v8  ;;  %vm732_vm7 = vweird.f32 %v681_v19 }
 0x39f   : > { %v739_v4 = vor.u32 1.1754944e-38, %v738_v52  ;;  %vm737_vm9 = vcmp.eq.f32.partialorder %v736_v60, 8.507059e+37  ;;  %v786_v16 = vmul.f32 1.442695, %v782_v3  ;;  %1174 = vpow2.f32 %v790_v7 }
 0x3a0   : > { %v715_v26 = vmul.f32 %v1171_v15, %v714_v22  ;;  %v747_v30 = vadd.f32 -1.4531521, %v743_v28  ;;  %v762_v2 = vadd.f32 -0.28449672, %v758_v49  ;;  %1176 = vpow2.f32 %v788_v11 }
 0x3a1   : > { %1178 = vpow2.f32 %v786_v16  ;;  %v663_v3 = vmul.f32 0.5, %v1518_v44 }
 0x3a2   : > { %v716_v29 = vadd.f32 %v1171_v15, %v715_v26  ;;  %v751_v35 = vmul.f32 %v747_v30, %v1548_v24 }
 0x3a3   : > { %v1173_v33 = vpop.eup %1172 }
 0x3a4   : > { %v720_v34 = vsel %vm719_vm4, %v1171_v15, %v716_v29  ;;  %v728_v40 = vmul.f32 %v1173_v33, %v681_v19  ;;  %v755_v47 = vadd.f32 1.4214138, %v751_v35  ;;  %vm733_vm6 = vweird.f32 %v1173_v33 }
 0x3a5   : > { %v725_v41 = vsel %vm722_vm5, %v724_v31, %v720_v34  ;;  %vm734_vm8 = vmor %vm732_vm7, %vm733_vm6  ;;  %v766_v15 = vmul.f32 %v762_v2, %v1541_v8  ;;  %v785_v19 = vmul.f32 %v781_v12, %v1544_v9  ;;  %v1175_v29 = vpop.eup %1174 }
 0x3a6   : > { %v744_v43 = vmul.f32 1.0614054, %v725_v41  ;;  %v729_v48 = vsub.f32 1.0, %v728_v40  ;;  %v759_v56 = vmul.f32 %v755_v47, %v1548_v24  ;;  %v1177_v32 = vpop.eup %1176 }
 0x3a7   : > { %v770_v22 = vadd.f32 0.2548296, %v766_v15  ;;  %v792_v27 = vmul.f32 1.442695, %v785_v19  ;;  %v1179_v36 = vpop.eup %1178 }
 0x3a8   : > { %v748_v54 = vadd.f32 -1.4531521, %v744_v43  ;;  %v730_v58 = vmul.f32 %v1173_v33, %v729_v48  ;;  %v763_v63 = vadd.f32 -0.28449672, %v759_v56 }
 0x3a9   : > { %v774_v31 = vmul.f32 %v770_v22, %v1541_v8  ;;  %1180 = vpow2.f32 %v792_v27 }
 0x3aa   : > { %v752_v62 = vmul.f32 %v748_v54, %v725_v41  ;;  %v731_v0 = vadd.f32 %v1173_v33, %v730_v58  ;;  %v767_v55 = vmul.f32 %v763_v63, %v1548_v24  ;;  %v664_v63 = vmul.f32 0.5, %v1527_v50 }
 0x3ab   : > { %v794_v42 = vmul.f32 %v1179_v36, %v774_v31 }
 0x3ac   : > { %v756_v5 = vadd.f32 1.4214138, %v752_v62  ;;  %v735_v10 = vsel %vm734_vm8, %v1173_v33, %v731_v0  ;;  %v771_v18 = vadd.f32 0.2548296, %v767_v55  ;;  %v665_v0 = vmul.f32 0.5, %v1536_v1 }
 0x3ad   : > { %v740_v13 = vsel %vm737_vm9, %v739_v4, %v735_v10  ;;  %v822_v1 = vld [vmem:[%s1647_s7] sm:$0xf] }
 0x3ae   : > { %v760_v46 = vmul.f32 %v756_v5, %v725_v41  ;;  %v745_v14 = vmul.f32 1.0614054, %v740_v13  ;;  %v775_v26 = vmul.f32 %v771_v18, %v1548_v24  ;;  %v798_v24 = vsub.f32 1.0, %v794_v42 }
 0x3af   : > { %v1181_v51 = vpop.eup %1180 }
 0x3b0   : > { %v764_v17 = vadd.f32 -0.28449672, %v760_v46  ;;  %v749_v39 = vadd.f32 -1.4531521, %v745_v14  ;;  %v795_v35 = vmul.f32 %v1177_v32, %v775_v26  ;;  %v806_v56 = vsub.f32 0.0, %v798_v24 }
 0x3b2   : > { %v768_v20 = vmul.f32 %v764_v17, %v725_v41  ;;  %v753_v21 = vmul.f32 %v749_v39, %v740_v13  ;;  %v799_v47 = vsub.f32 1.0, %v795_v35  ;;  %v810_v62 = vsel %vm802_vm12, %v798_v24, %v806_v56 }
 0x3b3   : > { %v814_v5 = vadd.f32 1.0, %v810_v62 }
 0x3b4   : > { %v772_v23 = vadd.f32 0.2548296, %v768_v20  ;;  %v757_v25 = vadd.f32 1.4214138, %v753_v21  ;;  %v807_v52 = vsub.f32 0.0, %v799_v47 }
 0x3b5   : > { %v818_v10 = vmul.f32 %v814_v5, %v662_v38 }
 0x3b6   : > { %v776_v28 = vmul.f32 %v772_v23, %v725_v41  ;;  %v761_v30 = vmul.f32 %v757_v25, %v740_v13  ;;  %v811_v58 = vsel %vm803_vm11, %v799_v47, %v807_v52 }
 0x3b7   : > { %v815_v53 = vadd.f32 1.0, %v811_v58 }
 0x3b8   : > { %v796_v33 = vmul.f32 %v1175_v29, %v776_v28  ;;  %v765_v34 = vadd.f32 -0.28449672, %v761_v30 }
 0x3b9   : > { %v819_v7 = vmul.f32 %v815_v53, %v663_v3 }
 0x3ba   : > { %v769_v9 = vmul.f32 %v765_v34, %v740_v13  ;;  %v800_v40 = vsub.f32 1.0, %v796_v33 }
 0x3bb   : > { %v823_v50 = vpack.c.bf16 %v819_v7, %v818_v10 }
 0x3bc   : > { %v773_v43 = vadd.f32 0.2548296, %v769_v9  ;;  %v808_v49 = vsub.f32 0.0, %v800_v40 }
 0x3be   : > { %v777_v48 = vmul.f32 %v773_v43, %v740_v13  ;;  %v812_v54 = vsel %vm804_vm10, %v800_v40, %v808_v49 }
 0x3bf   : > { %v816_v60 = vadd.f32 1.0, %v812_v54 }
 0x3c0   : > { %v797_v41 = vmul.f32 %v1181_v51, %v777_v48 }
 0x3c1   : > { %v820_v45 = vmul.f32 %v816_v60, %v664_v63 }
 0x3c2   : > { %v801_v8 = vsub.f32 1.0, %v797_v41 }
 0x3c4   : > { %v809_v57 = vsub.f32 0.0, %v801_v8 }
 0x3c6   : > { %v813_v61 = vsel %vm805_vm13, %v801_v8, %v809_v57 }
 0x3c7   : > { %v817_v2 = vadd.f32 1.0, %v813_v61 }
 0x3c9   : > { %v821_v4 = vmul.f32 %v817_v2, %v665_v0 }
 0x3cb   : > { %v824_v6 = vpack.c.bf16 %v821_v4, %v820_v45 }
 0x3cd   : > { %841 = vmatpush.bf16.msra.mxu3 %v824_v6 }
 0x3d1   : > { %842 = vmatpush.bf16.msra.mxu3 %v823_v50 }
 0x3d4   : > { %1055 = vmatmul.msk.bf16.vlgmr.msra.gmra.mxu3 %vm831_vm14, %v822_v1 }
 0x3d5   : > { %1209 = shalt.err (!%p1206_p7)
}
 0x3d6   : > { %1067 = dma.vmem_to_hbm [thread:$0]  (%p1423_p3), %s887_s0, 128, %s889_s1, %s856_s2   ;;  %v829_v37 = vpop.permute.xlu0 %828 }
 0x3d7   : > { %s868_s12 = scalar_lea.hbm %s1649_s9, %s1059_s29  ;;  %s1670_s24 = sshll.u32 %s1478_s22, 3 }
 0x3d8   : > { %s416_s21 = scalar_lea.vmem [#allocation2], %s1670_s24  ;;  %s872_s3 = sshll.u32 %s868_s12, 4  ;;  %s873_s3 = int_to_ptr.hbm [resolvable:$true] %s872_s3 }
 0x3d9   : > { %s870_s19 = sshll.u32 %s416_s21, 4  ;;  %s851_s4 = scalar_lea.sflag [#allocation3], %s1478_s22  ;;  %s871_s19 = int_to_ptr.vmem [resolvable:$true] %s870_s19 }
 0x3da   : > { %s1224_s17 = sshra.s32 %s873_s3, 4  ;;  %s1230_s29 = scalar_lea.hbm %s1649_s9, 64  ;;  %s1225_s17 = int_to_ptr.hbm [resolvable:$true] %s1224_s17 }
 0x3db   : > { %s1226_s0 = scalar_lea.hbm %s1225_s17, 8  ;;  %p1231_p12 = scmp.lt.s32.totalorder %s1225_s17, %s1649_s9 }
 0x3dc   : > { %p1227_p9 = scmp.ne.s32.totalorder %s1225_s17, %s1226_s0  ;;  %p1232_p13 = scmp.lt.s32.totalorder %s1230_s29, %s1226_s0 }
 0x3de   : > { %p1228_p10 = pnand %p1227_p9, %p1423_p3  ;;  %p1233_p0 = por %p1232_p13, %p1231_p12 }
 0x3e0   : > { %p1229_p11 = pneg %p1228_p10 }
 0x3e2   : > { %p1234_p1 = pnand %p1233_p0, %p1229_p11 }
 0x457   : > { %v844_v44 = vpop.f32.mrf.mxu3 }
 0x458   : > { %v845_v55 = vadd.f32 %v844_v44, %v829_v37 }
 0x45a   : > { %v848_v11 = vadd.f32 %v845_v55, %v1492_v59 }
 0x45c   : > { %849 = vst [vmem:[%s416_s21] sm:$0xff] %v848_v11 }
 0x45d   : > { %1237 = shalt.err (!%p1234_p1)
}
 0x45e   : > { %1066 = dma.vmem_to_hbm [thread:$0]  (%p1423_p3), %s871_s19, 128, %s873_s3, %s851_s4  }
 0x45f   : > { %v846_v59 = vpop.f32.mrf.mxu3 }
 0x460 PF: > { %p1077_p2 = scmp.ge.s32.totalorder %s1308_s20, 2  ;;  %s900_s22 = sand.u32 1, %s1280_s13  }
 0x461   : > { %s901_s23 = scalar_lea.sflag [#allocation3], %s900_s22 }
 0x462   : > { %p1071_p4 = pnand %p1077_p2, %p1432_p8 }
 0x464   : > { %p1072_p5 = pneg %p1071_p4 }
 0x466   : > { %1271 = dma.done.wait (%p1072_p5), %s901_s23, 128  }
 0x467   : > { %1273 = vsyncadd (%p1072_p5), %s901_s23, 4294967168  ;;  %s911_s25 = scalar_lea.sflag [#allocation5], %s900_s22 }
 0x468   : > { %1275 = dma.done.wait (%p1072_p5), %s911_s25, 128  }
 0x469   : > { %1277 = vsyncadd (%p1072_p5), %s911_s25, 4294967168  ;;  %s27_s20 = sadd.s32 1, %s1308_s20   ;;  %s1671_s17 = sld [smem:[#allocation8_spill]] }
 0x46a   : > { %p24_p6 = scmp.ge.s32.totalorder %s27_s20, 10   ;;  %s1672_s26 = sld [smem:[#allocation9_spill]] }
 0x46b   : > { %s1673_s19 = sld [smem:[#allocation10_spill]]  ;;  %s1674_s13 = smov %s1284_s14 }
 0x46c   : > { %s1675_s14 = smov %s1288_s15  ;;  %s1676_s15 = smov %s1441_s11 }
 0x46d   : > { %s1677_s16 = smov %s1300_s18  ;;  %26 = sbr.rel (!%p24_p6) target bundleno = 13 (0xd), region = 114 }
 0x470   : > { %s1678_s18 = smov %s1672_s26 }
 0x472   :  { %917 = vsyncpa [#allocation3], 1 }
 0x473   :  { %919 = vsyncpa [#allocation3 + $0x1], 1 }
 0x474   :  { %920 = vsyncpa [#allocation5], 1 }
 0x475   :  { %922 = vsyncpa [#allocation5 + $0x1], 1 }

</bundles_post_ra>
